<compile_context>
chip_gen: v7x
topology: tpu7x:2x2x1
jax: 0.10.0
libtpu: 0.0.40
codegen_flags: <defaults>
</compile_context>

<pallas_src>
import numpy as np
import jax
import jax.numpy as jnp
from jax import lax
from jax.experimental import pallas as pl
from jax.experimental.pallas import tpu as pltpu

SUBLANE = 8
LANE = 128


def _round_up(x, m):
    return ((x + m - 1) // m) * m


# ----------------------------- fused Pallas kernel ------------------------- #

def _decoder_kernel(emb_ref, vis_ref, mask_ref, wmlp_ref, bmlp_ref,
                    wihx_ref, wihv_ref, brnn_ref, whh_ref, wfc_ref, bfc_ref,
                    o_ref):
    # Per batch-group (NB = 8 sequences) refs:
    #   emb_ref : (T*NB, E)  bf16  embedded tokens, time-major within the group
    #                              (row r = t*NB + nb), length-sorted order
    #   vis_ref : (NB, Wv)   f32   vis_att_fuse rows, UNSORTED (as in reference)
    #   mask_ref: (T*NB, 1)  f32   1.0 where t < length(seq), else 0.0
    #   wmlp_ref: (E, Wv) bf16, bmlp_ref: (1, Wv) f32
    #   wihx_ref: (Wv, 4H) bf16 = W_ih[:, :Wv]^T   (mlp part)
    #   wihv_ref: (Wv, 4H) f32  = W_ih[:, Wv:]^T   (vis part, only active at t=0)
    #   brnn_ref: (1, 4H) f32 = b_ih + b_hh ; whh_ref: (H, 4H) f32 = W_hh^T
    #   wfc_ref : (H, Vp) bf16 fc.weight^T padded to 128 lanes ; bfc_ref: (1, Vp) f32
    #   o_ref   : (T*NB, Vp) f32
    NB = vis_ref.shape[0]
    H = whh_ref.shape[0]
    TNB = emb_ref.shape[0]
    T = TNB // NB
    f32 = jnp.float32
    bf16 = jnp.bfloat16

    # ---- Phase 1: MLP + hoisted input-to-hidden projection (batched GEMMs) ----
    mlp = jnp.maximum(
        jnp.dot(emb_ref[...], wmlp_ref[...], preferred_element_type=f32)
        + bmlp_ref[...], 0.0)                                          # (T*NB, Wv)
    gx = (jnp.dot(mlp.astype(bf16), wihx_ref[...], preferred_element_type=f32)
          + brnn_ref[...])                                             # (T*NB, 4H)
    # vis_att_fuse contributes only at t == 0 (rows [0, NB)); the zero padding of
    # vis for t >= 1 means the second half of the 2*Wv projection is only needed
    # for one timestep.  Kept as a value (no scratch, no double write).
    gx0 = gx[0:NB, :] + jnp.dot(vis_ref[...], wihv_ref[...],
                                preferred_element_type=f32)

    # ---- Phase 2: recurrence — only (NB,H)@(H,4H) + elementwise per step ----
    # One tanh pass per step: sigmoid(x) = 0.5*tanh(0.5*x) + 0.5, selected per
    # lane via constants built once here (PyTorch gate order i, f, g, o; only the
    # g gate uses a true tanh).
    lane = lax.broadcasted_iota(jnp.int32, (NB, 4 * H), 1)
    is_g = jnp.logical_and(lane >= 2 * H, lane < 3 * H)
    scale = jnp.where(is_g, 1.0, 0.5).astype(f32)
    off = jnp.where(is_g, 0.0, 0.5).astype(f32)

    h = jnp.zeros((NB, H), f32)
    c = jnp.zeros((NB, H), f32)
    hs = []
    for t in range(T):                                # static, fully unrolled
        g_in = gx0 if t == 0 else gx[t * NB:(t + 1) * NB, :]
        gates = g_in + jnp.dot(h, whh_ref[...], preferred_element_type=f32)
        th = jnp.tanh(gates * scale)                  # single EUP pass
        act = th * scale + off                        # sigmoid / tanh per lane
        i_g = act[:, 0 * H:1 * H]
        f_g = act[:, 1 * H:2 * H]
        g_g = act[:, 2 * H:3 * H]
        o_g = act[:, 3 * H:4 * H]
        c = f_g * c + i_g * g_g
        h = o_g * jnp.tanh(c)
        hs.append(h)                                  # raw h; mask applied in bulk

    # packed-sequence semantics: zero hidden at t >= length (fc(0) = bias below).
    hm = jnp.concatenate(hs, axis=0) * mask_ref[...]                   # (T*NB, H)

    # ---- Phase 3: final FC as one lane-dense (T*NB, H) @ (H, Vp) GEMM ----
    o_ref[...] = (jnp.dot(hm.astype(bf16), wfc_ref[...],
                          preferred_element_type=f32)
                  + bfc_ref[...])


def decoder_pallas(emb_gm, vis_p, mask_rows, w_mlp, b_mlp, wih_x, wih_v,
                   b_rnn, whh_t, wfc_p, bfc_p):
    TNBG, E = emb_gm.shape
    Np, Wv = vis_p.shape
    NB = SUBLANE
    G = Np // NB
    TNB = TNBG // G
    H = whh_t.shape[0]
    Vp = wfc_p.shape[1]

    def grp(shape):   # per-group block, indexed by the batch-group grid axis
        return pl.BlockSpec(shape, lambda g: (g, 0))

    def rep(shape):   # replicated (weights / biases), same block every step
        return pl.BlockSpec(shape, lambda g: (0, 0))

    return pl.pallas_call(
        _decoder_kernel,
        out_shape=jax.ShapeDtypeStruct((TNBG, Vp), jnp.float32),
        grid=(G,),
        in_specs=[
            grp((TNB, E)),         # emb (group-major, time-major inside group)
            grp((NB, Wv)),         # vis
            grp((TNB, 1)),         # packed-sequence mask
            rep((E, Wv)),          # w_mlp (bf16)
            rep((1, Wv)),          # b_mlp
            rep((Wv, 4 * H)),      # wih_x (bf16)
            rep((Wv, 4 * H)),      # wih_v (f32)
            rep((1, 4 * H)),       # b_rnn
            rep((H, 4 * H)),       # whh (f32)
            rep((H, Vp)),          # wfc (bf16, padded lanes)
            rep((1, Vp)),          # b_fc (padded lanes)
        ],
        out_specs=grp((TNB, Vp)),
        compiler_params=pltpu.CompilerParams(
            dimension_semantics=("parallel",)),      # independent batch groups
    )(emb_gm, vis_p, mask_rows, w_mlp, b_mlp, wih_x, wih_v, b_rnn, whh_t,
      wfc_p, bfc_p)


# ----------------------------- module forward ------------------------------ #

def init_params(key, vocab, E, Wv, H):
    ks = jax.random.split(key, 8)
    s = 0.1
    return dict(
        emb=jax.random.normal(ks[0], (vocab, E), jnp.float32) * s,
        w_mlp=jax.random.normal(ks[1], (E, Wv), jnp.float32) * s,
        b_mlp=jax.random.normal(ks[2], (1, Wv), jnp.float32) * s,
        wih_t=jax.random.normal(ks[3], (2 * Wv, 4 * H), jnp.float32) * s,  # W_ih^T
        whh_t=jax.random.normal(ks[4], (H, 4 * H), jnp.float32) * s,        # W_hh^T
        b_rnn=jax.random.normal(ks[5], (1, 4 * H), jnp.float32) * s,        # b_ih+b_hh
        wfc_t=jax.random.normal(ks[6], (H, vocab), jnp.float32) * s,        # fc.W^T
        b_fc=jax.random.normal(ks[7], (1, vocab), jnp.float32) * s,
    )


def _sort_indices(enc_labels):
    # Device-side replica of the numpy sorting glue in the PyTorch forward
    # (descending lengths; jnp.argsort is stable, matching np.argsort[::-1]'s
    # tie-break for these small batches). Computed on device so the whole
    # forward stays under jit with no host sync.
    lengths = (enc_labels != 0).sum(1).astype(jnp.int32)
    sort_ixs = jnp.flip(jnp.argsort(lengths)).astype(jnp.int32)
    recover_ixs = jnp.argsort(sort_ixs).astype(jnp.int32)   # inverse permutation
    sorted_lens = jnp.take(lengths, sort_ixs)
    return sort_ixs, recover_ixs, sorted_lens


def rnn_decoder_forward(params, vis_att_fuse, enc_labels):
    N, T = enc_labels.shape
    Np = _round_up(N, SUBLANE)                               # batch -> sublane pad
    NB = SUBLANE
    G = Np // NB
    V = params["wfc_t"].shape[1]
    Vp = _round_up(V, LANE)                                  # vocab -> lane pad
    Wv = params["w_mlp"].shape[1]

    # TODO(synk): the reference's host-side `assert max(len)==T` is verified in
    # __main__; it cannot be asserted under jit without a device->host sync.
    sort_ixs, recover_ixs, sorted_lens = _sort_indices(enc_labels)
    input_labels = jnp.take(enc_labels, sort_ixs, axis=0)              # (N, T) sorted

    # batch padding: padded rows get token 0 and length 0 (masked inside kernel)
    labels_p = jnp.pad(input_labels, ((0, Np - N), (0, 0)))            # (Np, T)
    lens_p = jnp.pad(sorted_lens, (0, Np - N)).astype(jnp.int32)       # (Np,)
    vis_p = jnp.pad(vis_att_fuse, ((0, Np - N), (0, 0)))               # UNSORTED (as ref)

    # Row order for the kernel: group-major, time-major inside a group
    # (row = g*T*NB + t*NB + nb).  Embedding gathered directly in that order.
    # TODO(synk): nn.Dropout layers are identity here (p=0 config / eval mode).
    ids = labels_p.reshape(G, NB, T).transpose(0, 2, 1).reshape(-1)    # (G*T*NB,)
    emb_gm = jnp.take(params["emb"].astype(jnp.bfloat16), ids, axis=0) # (G*T*NB, E)

    # packed-sequence mask in the same row order (1.0 for t < length)
    tmask = (jnp.arange(T)[None, :] < lens_p[:, None]).astype(jnp.float32)  # (Np, T)
    mask_rows = tmask.reshape(G, NB, T).transpose(0, 2, 1).reshape(-1, 1)

    # split W_ih^T into the mlp part (rows :Wv, bf16) and the vis part (rows Wv:, f32)
    wih_x = params["wih_t"][:Wv].astype(jnp.bfloat16)
    wih_v = params["wih_t"][Wv:]
    w_mlp_b = params["w_mlp"].astype(jnp.bfloat16)

    # pad fc to a lane-dense 128-wide output
    wfc_p = jnp.pad(params["wfc_t"], ((0, 0), (0, Vp - V))).astype(jnp.bfloat16)
    bfc_p = jnp.pad(params["b_fc"], ((0, 0), (0, Vp - V)))

    out2d = decoder_pallas(emb_gm, vis_p, mask_rows, w_mlp_b, params["b_mlp"],
                           wih_x, wih_v, params["b_rnn"], params["whh_t"],
                           wfc_p, bfc_p)                               # (G*T*NB, Vp)

    out = out2d.reshape(G, T, NB, Vp).transpose(0, 2, 1, 3).reshape(Np, T, Vp)
    out = out[:N, :, :V]                                               # strip padding
    out = jnp.take(out, recover_ixs, axis=0)                           # recover order
    return out.reshape(N * T, V)                                       # (N*T, vocab)


# ----------------------------- pure-JAX reference --------------------------- #

def reference_forward(params, vis_att_fuse, enc_labels):
    N, T = enc_labels.shape
    sort_ixs, recover_ixs, sorted_lens = _sort_indices(enc_labels)
    input_labels = jnp.take(enc_labels, sort_ixs, axis=0)
    emb = jnp.take(params["emb"], input_labels, axis=0)
    hi = lax.Precision.HIGHEST
    mlp_out = jnp.maximum(
        jnp.dot(emb, params["w_mlp"], precision=hi) + params["b_mlp"][0], 0.0)
    Wv = mlp_out.shape[-1]
    vis_pad = jnp.concatenate(
        [vis_att_fuse[:, None, :], jnp.zeros((N, T - 1, Wv), jnp.float32)], axis=1)
    x2 = jnp.concatenate([mlp_out, vis_pad], axis=2)
    H = params["whh_t"].shape[0]
    lens = sorted_lens[:, None]

    def step(carry, xt_t):
        h, c = carry
        xt, t = xt_t
        gates = (jnp.dot(xt, params["wih_t"], precision=hi)
                 + jnp.dot(h, params["whh_t"], precision=hi) + params["b_rnn"][0])
        i = jax.nn.sigmoid(gates[:, 0 * H:1 * H])
        f = jax.nn.sigmoid(gates[:, 1 * H:2 * H])
        g = jnp.tanh(gates[:, 2 * H:3 * H])
        o = jax.nn.sigmoid(gates[:, 3 * H:4 * H])
        c = f * c + i * g
        h = o * jnp.tanh(c)
        h_m = jnp.where(t < lens, h, 0.0)
        y = jnp.dot(h_m, params["wfc_t"], precision=hi) + params["b_fc"][0]
        return (h, c), y

    x_tm = jnp.transpose(x2, (1, 0, 2))
    (_, _), out_tm = lax.scan(step, (jnp.zeros((N, H)), jnp.zeros((N, H))),
                              (x_tm, jnp.arange(T)))
    out = jnp.transpose(out_tm, (1, 0, 2))
    out = jnp.take(out, recover_ixs, axis=0)
    return out.reshape(N * T, -1)


# --------------------------------- main ------------------------------------ #

if __name__ == "__main__":
    opt = dict(variable_lengths=1, vocab_size=50, word_embedding_size=32,
               word_vec_size=32, rnn_hidden_size=32, decode_bidirectional=0,
               word_drop_out=0.0, rnn_drop_out=0.0, rnn_num_layers=1,
               rnn_type="lstm")
    N, T = 4, 8
    vocab, E, Wv, H = (opt["vocab_size"], opt["word_embedding_size"],
                       opt["word_vec_size"], opt["rnn_hidden_size"])

    key = jax.random.PRNGKey(0)
    kp, kl, kv = jax.random.split(key, 3)
    params = init_params(kp, vocab, E, Wv, H)

    # labels: nonzero tokens for the first len[i] steps, 0 (pad) afterwards;
    # at least one sequence has full length T (the reference asserts this).
    lens = np.array([T, 5, T, 3], dtype=np.int32)
    assert int(lens.max()) == T
    toks = np.asarray(jax.random.randint(kl, (N, T), 1, vocab, dtype=jnp.int32))
    mask = np.arange(T)[None, :] < lens[:, None]
    enc_labels = jnp.asarray(np.where(mask, toks, 0), dtype=jnp.int32)

    vis_att_fuse = jax.random.normal(kv, (N, Wv), jnp.float32)

    forward = jax.jit(rnn_decoder_forward)
    out = jax.block_until_ready(forward(params, vis_att_fuse, enc_labels))
    assert out.shape == (N * T, vocab)

    ref = jax.block_until_ready(reference_forward(params, vis_att_fuse, enc_labels))
    np.testing.assert_allclose(np.asarray(out), np.asarray(ref),
                               rtol=5e-3, atol=5e-3)
    print("KERNEL_OK")
</pallas_src>

<mosaic_0001>
module attributes {stable_mosaic.version = 11 : i64} {
  func.func @_decoder_kernel(%arg0: i32, %arg1: memref<64x32xbf16, #tpu.memory_space<vmem>>, %arg2: memref<8x32xf32, #tpu.memory_space<vmem>>, %arg3: memref<64x1xf32, #tpu.memory_space<vmem>>, %arg4: memref<32x32xbf16, #tpu.memory_space<vmem>>, %arg5: memref<1x32xf32, #tpu.memory_space<vmem>>, %arg6: memref<32x128xbf16, #tpu.memory_space<vmem>>, %arg7: memref<32x128xf32, #tpu.memory_space<vmem>>, %arg8: memref<1x128xf32, #tpu.memory_space<vmem>>, %arg9: memref<32x128xf32, #tpu.memory_space<vmem>>, %arg10: memref<32x128xbf16, #tpu.memory_space<vmem>>, %arg11: memref<1x128xf32, #tpu.memory_space<vmem>>, %arg12: memref<64x128xf32, #tpu.memory_space<vmem>>) attributes {dimension_semantics = [#tpu.dimension_semantics<parallel>], iteration_bounds = array<i64: 1>, scalar_prefetch = 0 : i64, scratch_operands = 0 : i64, tpu.core_type = #tpu.core_type<tc>, window_params = [{transform_indices = @transform_0, window_bounds = array<i64: 64, 32>}, {transform_indices = @transform_1, window_bounds = array<i64: 8, 32>}, {transform_indices = @transform_2, window_bounds = array<i64: 64, 1>}, {pipeline_mode = #tpu.pipeline_mode<synchronous>, transform_indices = @transform_3, window_bounds = array<i64: 32, 32>}, {pipeline_mode = #tpu.pipeline_mode<synchronous>, transform_indices = @transform_4, window_bounds = array<i64: 1, 32>}, {pipeline_mode = #tpu.pipeline_mode<synchronous>, transform_indices = @transform_5, window_bounds = array<i64: 32, 128>}, {pipeline_mode = #tpu.pipeline_mode<synchronous>, transform_indices = @transform_6, window_bounds = array<i64: 32, 128>}, {pipeline_mode = #tpu.pipeline_mode<synchronous>, transform_indices = @transform_7, window_bounds = array<i64: 1, 128>}, {pipeline_mode = #tpu.pipeline_mode<synchronous>, transform_indices = @transform_8, window_bounds = array<i64: 32, 128>}, {pipeline_mode = #tpu.pipeline_mode<synchronous>, transform_indices = @transform_9, window_bounds = array<i64: 32, 128>}, {pipeline_mode = #tpu.pipeline_mode<synchronous>, transform_indices = @transform_10, window_bounds = array<i64: 1, 128>}, {transform_indices = @transform_11, window_bounds = array<i64: 64, 128>}]} {
    %c0 = arith.constant 0 : index
    %c0_0 = arith.constant 0 : index
    %0 = vector.load %arg1[%c0, %c0_0] : memref<64x32xbf16, #tpu.memory_space<vmem>>, vector<64x32xbf16>
    %c0_1 = arith.constant 0 : index
    %c0_2 = arith.constant 0 : index
    %1 = vector.load %arg4[%c0_1, %c0_2] : memref<32x32xbf16, #tpu.memory_space<vmem>>, vector<32x32xbf16>
    %cst = arith.constant dense<0.000000e+00> : vector<64x32xf32>
    %2 = tpu.matmul %0, %1, %cst {dimension_numbers = #tpu.dot_dimension_numbers<[1], [0], [0], [1], [0, 0, 1, 1], [], []>} : vector<64x32xbf16>, vector<32x32xbf16>, vector<64x32xf32> -> vector<64x32xf32>
    %c0_3 = arith.constant 0 : index
    %c0_4 = arith.constant 0 : index
    %3 = vector.load %arg5[%c0_3, %c0_4] : memref<1x32xf32, #tpu.memory_space<vmem>>, vector<1x32xf32>
    %4 = vector.broadcast %3 : vector<1x32xf32> to vector<64x32xf32>
    %5 = arith.addf %2, %4 : vector<64x32xf32>
    %cst_5 = arith.constant 0.000000e+00 : f32
    %6 = vector.broadcast %cst_5 : f32 to vector<64x32xf32>
    %7 = arith.maximumf %5, %6 : vector<64x32xf32>
    %8 = arith.truncf %7 : vector<64x32xf32> to vector<64x32xbf16>
    %c0_6 = arith.constant 0 : index
    %c0_7 = arith.constant 0 : index
    %9 = vector.load %arg6[%c0_6, %c0_7] : memref<32x128xbf16, #tpu.memory_space<vmem>>, vector<32x128xbf16>
    %cst_8 = arith.constant dense<0.000000e+00> : vector<64x128xf32>
    %10 = tpu.matmul %8, %9, %cst_8 {dimension_numbers = #tpu.dot_dimension_numbers<[1], [0], [0], [1], [0, 0, 1, 1], [], []>} : vector<64x32xbf16>, vector<32x128xbf16>, vector<64x128xf32> -> vector<64x128xf32>
    %c0_9 = arith.constant 0 : index
    %c0_10 = arith.constant 0 : index
    %11 = vector.load %arg8[%c0_9, %c0_10] : memref<1x128xf32, #tpu.memory_space<vmem>>, vector<1x128xf32>
    %12 = vector.broadcast %11 : vector<1x128xf32> to vector<64x128xf32>
    %13 = arith.addf %10, %12 : vector<64x128xf32>
    %14 = vector.extract_strided_slice %13 {offsets = [0, 0], sizes = [8, 128], strides = [1, 1]} : vector<64x128xf32> to vector<8x128xf32>
    %c0_11 = arith.constant 0 : index
    %c0_12 = arith.constant 0 : index
    %15 = vector.load %arg2[%c0_11, %c0_12] : memref<8x32xf32, #tpu.memory_space<vmem>>, vector<8x32xf32>
    %c0_13 = arith.constant 0 : index
    %c0_14 = arith.constant 0 : index
    %16 = vector.load %arg7[%c0_13, %c0_14] : memref<32x128xf32, #tpu.memory_space<vmem>>, vector<32x128xf32>
    %cst_15 = arith.constant dense<0.000000e+00> : vector<8x128xf32>
    %17 = tpu.matmul %15, %16, %cst_15 {dimension_numbers = #tpu.dot_dimension_numbers<[1], [0], [0], [1], [0, 0, 1, 1], [], []>} : vector<8x32xf32>, vector<32x128xf32>, vector<8x128xf32> -> vector<8x128xf32>
    %18 = arith.addf %14, %17 : vector<8x128xf32>
    %19 = tpu.iota {dimensions = array<i32: 1>} : vector<8x128xi32>
    %c64_i32 = arith.constant 64 : i32
    %20 = vector.broadcast %c64_i32 : i32 to vector<8x128xi32>
    %21 = arith.cmpi sge, %19, %20 : vector<8x128xi32>
    %c96_i32 = arith.constant 96 : i32
    %22 = vector.broadcast %c96_i32 : i32 to vector<8x128xi32>
    %23 = arith.cmpi slt, %19, %22 : vector<8x128xi32>
    %24 = arith.andi %21, %23 : vector<8x128xi1>
    %cst_16 = arith.constant 1.000000e+00 : f32
    %cst_17 = arith.constant 5.000000e-01 : f32
    %25 = vector.broadcast %cst_16 : f32 to vector<8x128xf32>
    %26 = vector.broadcast %cst_17 : f32 to vector<8x128xf32>
    %27 = arith.select %24, %25, %26 : vector<8x128xi1>, vector<8x128xf32>
    %cst_18 = arith.constant 0.000000e+00 : f32
    %cst_19 = arith.constant 5.000000e-01 : f32
    %28 = vector.broadcast %cst_18 : f32 to vector<8x128xf32>
    %29 = vector.broadcast %cst_19 : f32 to vector<8x128xf32>
    %30 = arith.select %24, %28, %29 : vector<8x128xi1>, vector<8x128xf32>
    %cst_20 = arith.constant 0.000000e+00 : f32
    %31 = vector.broadcast %cst_20 : f32 to vector<8x32xf32>
    %cst_21 = arith.constant 0.000000e+00 : f32
    %32 = vector.broadcast %cst_21 : f32 to vector<8x32xf32>
    %c0_22 = arith.constant 0 : index
    %c0_23 = arith.constant 0 : index
    %33 = vector.load %arg9[%c0_22, %c0_23] : memref<32x128xf32, #tpu.memory_space<vmem>>, vector<32x128xf32>
    %cst_24 = arith.constant dense<0.000000e+00> : vector<8x128xf32>
    %34 = tpu.matmul %31, %33, %cst_24 {dimension_numbers = #tpu.dot_dimension_numbers<[1], [0], [0], [1], [0, 0, 1, 1], [], []>} : vector<8x32xf32>, vector<32x128xf32>, vector<8x128xf32> -> vector<8x128xf32>
    %35 = arith.addf %18, %34 : vector<8x128xf32>
    %36 = arith.mulf %35, %27 : vector<8x128xf32>
    %37 = math.tanh %36 : vector<8x128xf32>
    %38 = arith.mulf %37, %27 : vector<8x128xf32>
    %39 = arith.addf %38, %30 : vector<8x128xf32>
    %40 = vector.extract_strided_slice %39 {offsets = [0, 0], sizes = [8, 32], strides = [1, 1]} : vector<8x128xf32> to vector<8x32xf32>
    %41 = vector.extract_strided_slice %39 {offsets = [0, 32], sizes = [8, 32], strides = [1, 1]} : vector<8x128xf32> to vector<8x32xf32>
    %42 = vector.extract_strided_slice %39 {offsets = [0, 64], sizes = [8, 32], strides = [1, 1]} : vector<8x128xf32> to vector<8x32xf32>
    %43 = vector.extract_strided_slice %39 {offsets = [0, 96], sizes = [8, 32], strides = [1, 1]} : vector<8x128xf32> to vector<8x32xf32>
    %44 = arith.mulf %41, %32 : vector<8x32xf32>
    %45 = arith.mulf %40, %42 : vector<8x32xf32>
    %46 = arith.addf %44, %45 : vector<8x32xf32>
    %47 = math.tanh %46 : vector<8x32xf32>
    %48 = arith.mulf %43, %47 : vector<8x32xf32>
    %49 = vector.extract_strided_slice %13 {offsets = [8, 0], sizes = [8, 128], strides = [1, 1]} : vector<64x128xf32> to vector<8x128xf32>
    %c0_25 = arith.constant 0 : index
    %c0_26 = arith.constant 0 : index
    %50 = vector.load %arg9[%c0_25, %c0_26] : memref<32x128xf32, #tpu.memory_space<vmem>>, vector<32x128xf32>
    %cst_27 = arith.constant dense<0.000000e+00> : vector<8x128xf32>
    %51 = tpu.matmul %48, %50, %cst_27 {dimension_numbers = #tpu.dot_dimension_numbers<[1], [0], [0], [1], [0, 0, 1, 1], [], []>} : vector<8x32xf32>, vector<32x128xf32>, vector<8x128xf32> -> vector<8x128xf32>
    %52 = arith.addf %49, %51 : vector<8x128xf32>
    %53 = arith.mulf %52, %27 : vector<8x128xf32>
    %54 = math.tanh %53 : vector<8x128xf32>
    %55 = arith.mulf %54, %27 : vector<8x128xf32>
    %56 = arith.addf %55, %30 : vector<8x128xf32>
    %57 = vector.extract_strided_slice %56 {offsets = [0, 0], sizes = [8, 32], strides = [1, 1]} : vector<8x128xf32> to vector<8x32xf32>
    %58 = vector.extract_strided_slice %56 {offsets = [0, 32], sizes = [8, 32], strides = [1, 1]} : vector<8x128xf32> to vector<8x32xf32>
    %59 = vector.extract_strided_slice %56 {offsets = [0, 64], sizes = [8, 32], strides = [1, 1]} : vector<8x128xf32> to vector<8x32xf32>
    %60 = vector.extract_strided_slice %56 {offsets = [0, 96], sizes = [8, 32], strides = [1, 1]} : vector<8x128xf32> to vector<8x32xf32>
    %61 = arith.mulf %58, %46 : vector<8x32xf32>
    %62 = arith.mulf %57, %59 : vector<8x32xf32>
    %63 = arith.addf %61, %62 : vector<8x32xf32>
    %64 = math.tanh %63 : vector<8x32xf32>
    %65 = arith.mulf %60, %64 : vector<8x32xf32>
    %66 = vector.extract_strided_slice %13 {offsets = [16, 0], sizes = [8, 128], strides = [1, 1]} : vector<64x128xf32> to vector<8x128xf32>
    %c0_28 = arith.constant 0 : index
    %c0_29 = arith.constant 0 : index
    %67 = vector.load %arg9[%c0_28, %c0_29] : memref<32x128xf32, #tpu.memory_space<vmem>>, vector<32x128xf32>
    %cst_30 = arith.constant dense<0.000000e+00> : vector<8x128xf32>
    %68 = tpu.matmul %65, %67, %cst_30 {dimension_numbers = #tpu.dot_dimension_numbers<[1], [0], [0], [1], [0, 0, 1, 1], [], []>} : vector<8x32xf32>, vector<32x128xf32>, vector<8x128xf32> -> vector<8x128xf32>
    %69 = arith.addf %66, %68 : vector<8x128xf32>
    %70 = arith.mulf %69, %27 : vector<8x128xf32>
    %71 = math.tanh %70 : vector<8x128xf32>
    %72 = arith.mulf %71, %27 : vector<8x128xf32>
    %73 = arith.addf %72, %30 : vector<8x128xf32>
    %74 = vector.extract_strided_slice %73 {offsets = [0, 0], sizes = [8, 32], strides = [1, 1]} : vector<8x128xf32> to vector<8x32xf32>
    %75 = vector.extract_strided_slice %73 {offsets = [0, 32], sizes = [8, 32], strides = [1, 1]} : vector<8x128xf32> to vector<8x32xf32>
    %76 = vector.extract_strided_slice %73 {offsets = [0, 64], sizes = [8, 32], strides = [1, 1]} : vector<8x128xf32> to vector<8x32xf32>
    %77 = vector.extract_strided_slice %73 {offsets = [0, 96], sizes = [8, 32], strides = [1, 1]} : vector<8x128xf32> to vector<8x32xf32>
    %78 = arith.mulf %75, %63 : vector<8x32xf32>
    %79 = arith.mulf %74, %76 : vector<8x32xf32>
    %80 = arith.addf %78, %79 : vector<8x32xf32>
    %81 = math.tanh %80 : vector<8x32xf32>
    %82 = arith.mulf %77, %81 : vector<8x32xf32>
    %83 = vector.extract_strided_slice %13 {offsets = [24, 0], sizes = [8, 128], strides = [1, 1]} : vector<64x128xf32> to vector<8x128xf32>
    %c0_31 = arith.constant 0 : index
    %c0_32 = arith.constant 0 : index
    %84 = vector.load %arg9[%c0_31, %c0_32] : memref<32x128xf32, #tpu.memory_space<vmem>>, vector<32x128xf32>
    %cst_33 = arith.constant dense<0.000000e+00> : vector<8x128xf32>
    %85 = tpu.matmul %82, %84, %cst_33 {dimension_numbers = #tpu.dot_dimension_numbers<[1], [0], [0], [1], [0, 0, 1, 1], [], []>} : vector<8x32xf32>, vector<32x128xf32>, vector<8x128xf32> -> vector<8x128xf32>
    %86 = arith.addf %83, %85 : vector<8x128xf32>
    %87 = arith.mulf %86, %27 : vector<8x128xf32>
    %88 = math.tanh %87 : vector<8x128xf32>
    %89 = arith.mulf %88, %27 : vector<8x128xf32>
    %90 = arith.addf %89, %30 : vector<8x128xf32>
    %91 = vector.extract_strided_slice %90 {offsets = [0, 0], sizes = [8, 32], strides = [1, 1]} : vector<8x128xf32> to vector<8x32xf32>
    %92 = vector.extract_strided_slice %90 {offsets = [0, 32], sizes = [8, 32], strides = [1, 1]} : vector<8x128xf32> to vector<8x32xf32>
    %93 = vector.extract_strided_slice %90 {offsets = [0, 64], sizes = [8, 32], strides = [1, 1]} : vector<8x128xf32> to vector<8x32xf32>
    %94 = vector.extract_strided_slice %90 {offsets = [0, 96], sizes = [8, 32], strides = [1, 1]} : vector<8x128xf32> to vector<8x32xf32>
    %95 = arith.mulf %92, %80 : vector<8x32xf32>
    %96 = arith.mulf %91, %93 : vector<8x32xf32>
    %97 = arith.addf %95, %96 : vector<8x32xf32>
    %98 = math.tanh %97 : vector<8x32xf32>
    %99 = arith.mulf %94, %98 : vector<8x32xf32>
    %100 = vector.extract_strided_slice %13 {offsets = [32, 0], sizes = [8, 128], strides = [1, 1]} : vector<64x128xf32> to vector<8x128xf32>
    %c0_34 = arith.constant 0 : index
    %c0_35 = arith.constant 0 : index
    %101 = vector.load %arg9[%c0_34, %c0_35] : memref<32x128xf32, #tpu.memory_space<vmem>>, vector<32x128xf32>
    %cst_36 = arith.constant dense<0.000000e+00> : vector<8x128xf32>
    %102 = tpu.matmul %99, %101, %cst_36 {dimension_numbers = #tpu.dot_dimension_numbers<[1], [0], [0], [1], [0, 0, 1, 1], [], []>} : vector<8x32xf32>, vector<32x128xf32>, vector<8x128xf32> -> vector<8x128xf32>
    %103 = arith.addf %100, %102 : vector<8x128xf32>
    %104 = arith.mulf %103, %27 : vector<8x128xf32>
    %105 = math.tanh %104 : vector<8x128xf32>
    %106 = arith.mulf %105, %27 : vector<8x128xf32>
    %107 = arith.addf %106, %30 : vector<8x128xf32>
    %108 = vector.extract_strided_slice %107 {offsets = [0, 0], sizes = [8, 32], strides = [1, 1]} : vector<8x128xf32> to vector<8x32xf32>
    %109 = vector.extract_strided_slice %107 {offsets = [0, 32], sizes = [8, 32], strides = [1, 1]} : vector<8x128xf32> to vector<8x32xf32>
    %110 = vector.extract_strided_slice %107 {offsets = [0, 64], sizes = [8, 32], strides = [1, 1]} : vector<8x128xf32> to vector<8x32xf32>
    %111 = vector.extract_strided_slice %107 {offsets = [0, 96], sizes = [8, 32], strides = [1, 1]} : vector<8x128xf32> to vector<8x32xf32>
    %112 = arith.mulf %109, %97 : vector<8x32xf32>
    %113 = arith.mulf %108, %110 : vector<8x32xf32>
    %114 = arith.addf %112, %113 : vector<8x32xf32>
    %115 = math.tanh %114 : vector<8x32xf32>
    %116 = arith.mulf %111, %115 : vector<8x32xf32>
    %117 = vector.extract_strided_slice %13 {offsets = [40, 0], sizes = [8, 128], strides = [1, 1]} : vector<64x128xf32> to vector<8x128xf32>
    %c0_37 = arith.constant 0 : index
    %c0_38 = arith.constant 0 : index
    %118 = vector.load %arg9[%c0_37, %c0_38] : memref<32x128xf32, #tpu.memory_space<vmem>>, vector<32x128xf32>
    %cst_39 = arith.constant dense<0.000000e+00> : vector<8x128xf32>
    %119 = tpu.matmul %116, %118, %cst_39 {dimension_numbers = #tpu.dot_dimension_numbers<[1], [0], [0], [1], [0, 0, 1, 1], [], []>} : vector<8x32xf32>, vector<32x128xf32>, vector<8x128xf32> -> vector<8x128xf32>
    %120 = arith.addf %117, %119 : vector<8x128xf32>
    %121 = arith.mulf %120, %27 : vector<8x128xf32>
    %122 = math.tanh %121 : vector<8x128xf32>
    %123 = arith.mulf %122, %27 : vector<8x128xf32>
    %124 = arith.addf %123, %30 : vector<8x128xf32>
    %125 = vector.extract_strided_slice %124 {offsets = [0, 0], sizes = [8, 32], strides = [1, 1]} : vector<8x128xf32> to vector<8x32xf32>
    %126 = vector.extract_strided_slice %124 {offsets = [0, 32], sizes = [8, 32], strides = [1, 1]} : vector<8x128xf32> to vector<8x32xf32>
    %127 = vector.extract_strided_slice %124 {offsets = [0, 64], sizes = [8, 32], strides = [1, 1]} : vector<8x128xf32> to vector<8x32xf32>
    %128 = vector.extract_strided_slice %124 {offsets = [0, 96], sizes = [8, 32], strides = [1, 1]} : vector<8x128xf32> to vector<8x32xf32>
    %129 = arith.mulf %126, %114 : vector<8x32xf32>
    %130 = arith.mulf %125, %127 : vector<8x32xf32>
    %131 = arith.addf %129, %130 : vector<8x32xf32>
    %132 = math.tanh %131 : vector<8x32xf32>
    %133 = arith.mulf %128, %132 : vector<8x32xf32>
    %134 = vector.extract_strided_slice %13 {offsets = [48, 0], sizes = [8, 128], strides = [1, 1]} : vector<64x128xf32> to vector<8x128xf32>
    %c0_40 = arith.constant 0 : index
    %c0_41 = arith.constant 0 : index
    %135 = vector.load %arg9[%c0_40, %c0_41] : memref<32x128xf32, #tpu.memory_space<vmem>>, vector<32x128xf32>
    %cst_42 = arith.constant dense<0.000000e+00> : vector<8x128xf32>
    %136 = tpu.matmul %133, %135, %cst_42 {dimension_numbers = #tpu.dot_dimension_numbers<[1], [0], [0], [1], [0, 0, 1, 1], [], []>} : vector<8x32xf32>, vector<32x128xf32>, vector<8x128xf32> -> vector<8x128xf32>
    %137 = arith.addf %134, %136 : vector<8x128xf32>
    %138 = arith.mulf %137, %27 : vector<8x128xf32>
    %139 = math.tanh %138 : vector<8x128xf32>
    %140 = arith.mulf %139, %27 : vector<8x128xf32>
    %141 = arith.addf %140, %30 : vector<8x128xf32>
    %142 = vector.extract_strided_slice %141 {offsets = [0, 0], sizes = [8, 32], strides = [1, 1]} : vector<8x128xf32> to vector<8x32xf32>
    %143 = vector.extract_strided_slice %141 {offsets = [0, 32], sizes = [8, 32], strides = [1, 1]} : vector<8x128xf32> to vector<8x32xf32>
    %144 = vector.extract_strided_slice %141 {offsets = [0, 64], sizes = [8, 32], strides = [1, 1]} : vector<8x128xf32> to vector<8x32xf32>
    %145 = vector.extract_strided_slice %141 {offsets = [0, 96], sizes = [8, 32], strides = [1, 1]} : vector<8x128xf32> to vector<8x32xf32>
    %146 = arith.mulf %143, %131 : vector<8x32xf32>
    %147 = arith.mulf %142, %144 : vector<8x32xf32>
    %148 = arith.addf %146, %147 : vector<8x32xf32>
    %149 = math.tanh %148 : vector<8x32xf32>
    %150 = arith.mulf %145, %149 : vector<8x32xf32>
    %151 = vector.extract_strided_slice %13 {offsets = [56, 0], sizes = [8, 128], strides = [1, 1]} : vector<64x128xf32> to vector<8x128xf32>
    %c0_43 = arith.constant 0 : index
    %c0_44 = arith.constant 0 : index
    %152 = vector.load %arg9[%c0_43, %c0_44] : memref<32x128xf32, #tpu.memory_space<vmem>>, vector<32x128xf32>
    %cst_45 = arith.constant dense<0.000000e+00> : vector<8x128xf32>
    %153 = tpu.matmul %150, %152, %cst_45 {dimension_numbers = #tpu.dot_dimension_numbers<[1], [0], [0], [1], [0, 0, 1, 1], [], []>} : vector<8x32xf32>, vector<32x128xf32>, vector<8x128xf32> -> vector<8x128xf32>
    %154 = arith.addf %151, %153 : vector<8x128xf32>
    %155 = arith.mulf %154, %27 : vector<8x128xf32>
    %156 = math.tanh %155 : vector<8x128xf32>
    %157 = arith.mulf %156, %27 : vector<8x128xf32>
    %158 = arith.addf %157, %30 : vector<8x128xf32>
    %159 = vector.extract_strided_slice %158 {offsets = [0, 0], sizes = [8, 32], strides = [1, 1]} : vector<8x128xf32> to vector<8x32xf32>
    %160 = vector.extract_strided_slice %158 {offsets = [0, 32], sizes = [8, 32], strides = [1, 1]} : vector<8x128xf32> to vector<8x32xf32>
    %161 = vector.extract_strided_slice %158 {offsets = [0, 64], sizes = [8, 32], strides = [1, 1]} : vector<8x128xf32> to vector<8x32xf32>
    %162 = vector.extract_strided_slice %158 {offsets = [0, 96], sizes = [8, 32], strides = [1, 1]} : vector<8x128xf32> to vector<8x32xf32>
    %163 = arith.mulf %160, %148 : vector<8x32xf32>
    %164 = arith.mulf %159, %161 : vector<8x32xf32>
    %165 = arith.addf %163, %164 : vector<8x32xf32>
    %166 = math.tanh %165 : vector<8x32xf32>
    %167 = arith.mulf %162, %166 : vector<8x32xf32>
    %168 = tpu.concatenate %48, %65, %82, %99, %116, %133, %150, %167 in 0 : vector<8x32xf32>, vector<8x32xf32>, vector<8x32xf32>, vector<8x32xf32>, vector<8x32xf32>, vector<8x32xf32>, vector<8x32xf32>, vector<8x32xf32> -> vector<64x32xf32>
    %c0_46 = arith.constant 0 : index
    %c0_47 = arith.constant 0 : index
    %169 = vector.load %arg3[%c0_46, %c0_47] : memref<64x1xf32, #tpu.memory_space<vmem>>, vector<64x1xf32>
    %170 = vector.broadcast %169 : vector<64x1xf32> to vector<64x32xf32>
    %171 = arith.mulf %168, %170 : vector<64x32xf32>
    %172 = arith.truncf %171 : vector<64x32xf32> to vector<64x32xbf16>
    %c0_48 = arith.constant 0 : index
    %c0_49 = arith.constant 0 : index
    %173 = vector.load %arg10[%c0_48, %c0_49] : memref<32x128xbf16, #tpu.memory_space<vmem>>, vector<32x128xbf16>
    %cst_50 = arith.constant dense<0.000000e+00> : vector<64x128xf32>
    %174 = tpu.matmul %172, %173, %cst_50 {dimension_numbers = #tpu.dot_dimension_numbers<[1], [0], [0], [1], [0, 0, 1, 1], [], []>} : vector<64x32xbf16>, vector<32x128xbf16>, vector<64x128xf32> -> vector<64x128xf32>
    %c0_51 = arith.constant 0 : index
    %c0_52 = arith.constant 0 : index
    %175 = vector.load %arg11[%c0_51, %c0_52] : memref<1x128xf32, #tpu.memory_space<vmem>>, vector<1x128xf32>
    %176 = vector.broadcast %175 : vector<1x128xf32> to vector<64x128xf32>
    %177 = arith.addf %174, %176 : vector<64x128xf32>
    %c0_53 = arith.constant 0 : index
    %c0_54 = arith.constant 0 : index
    %178 = vector.load %arg12[%c0_53, %c0_54] : memref<64x128xf32, #tpu.memory_space<vmem>>, vector<64x128xf32>
    tpu.vector_store %arg12[%c0_53, %c0_54], %177 {strides = array<i32>} : memref<64x128xf32, #tpu.memory_space<vmem>>, vector<64x128xf32>,
    return
  }
  func.func @transform_0(%arg0: i32) -> (i32, i32) {
    %c0_i32 = arith.constant 0 : i32
    %c0_i32_0 = arith.constant 0 : i32
    return %arg0, %c0_i32 : i32, i32
  }
  func.func @transform_1(%arg0: i32) -> (i32, i32) {
    %c0_i32 = arith.constant 0 : i32
    %c0_i32_0 = arith.constant 0 : i32
    return %arg0, %c0_i32 : i32, i32
  }
  func.func @transform_2(%arg0: i32) -> (i32, i32) {
    %c0_i32 = arith.constant 0 : i32
    %c0_i32_0 = arith.constant 0 : i32
    return %arg0, %c0_i32 : i32, i32
  }
  func.func @transform_3(%arg0: i32) -> (i32, i32) {
    %c0_i32 = arith.constant 0 : i32
    %c0_i32_0 = arith.constant 0 : i32
    %c0_i32_1 = arith.constant 0 : i32
    return %c0_i32, %c0_i32_0 : i32, i32
  }
  func.func @transform_4(%arg0: i32) -> (i32, i32) {
    %c0_i32 = arith.constant 0 : i32
    %c0_i32_0 = arith.constant 0 : i32
    %c0_i32_1 = arith.constant 0 : i32
    return %c0_i32, %c0_i32_0 : i32, i32
  }
  func.func @transform_5(%arg0: i32) -> (i32, i32) {
    %c0_i32 = arith.constant 0 : i32
    %c0_i32_0 = arith.constant 0 : i32
    %c0_i32_1 = arith.constant 0 : i32
    return %c0_i32, %c0_i32_0 : i32, i32
  }
  func.func @transform_6(%arg0: i32) -> (i32, i32) {
    %c0_i32 = arith.constant 0 : i32
    %c0_i32_0 = arith.constant 0 : i32
    %c0_i32_1 = arith.constant 0 : i32
    return %c0_i32, %c0_i32_0 : i32, i32
  }
  func.func @transform_7(%arg0: i32) -> (i32, i32) {
    %c0_i32 = arith.constant 0 : i32
    %c0_i32_0 = arith.constant 0 : i32
    %c0_i32_1 = arith.constant 0 : i32
    return %c0_i32, %c0_i32_0 : i32, i32
  }
  func.func @transform_8(%arg0: i32) -> (i32, i32) {
    %c0_i32 = arith.constant 0 : i32
    %c0_i32_0 = arith.constant 0 : i32
    %c0_i32_1 = arith.constant 0 : i32
    return %c0_i32, %c0_i32_0 : i32, i32
  }
  func.func @transform_9(%arg0: i32) -> (i32, i32) {
    %c0_i32 = arith.constant 0 : i32
    %c0_i32_0 = arith.constant 0 : i32
    %c0_i32_1 = arith.constant 0 : i32
    return %c0_i32, %c0_i32_0 : i32, i32
  }
  func.func @transform_10(%arg0: i32) -> (i32, i32) {
    %c0_i32 = arith.constant 0 : i32
    %c0_i32_0 = arith.constant 0 : i32
    %c0_i32_1 = arith.constant 0 : i32
    return %c0_i32, %c0_i32_0 : i32, i32
  }
  func.func @transform_11(%arg0: i32) -> (i32, i32) {
    %c0_i32 = arith.constant 0 : i32
    %c0_i32_0 = arith.constant 0 : i32
    return %arg0, %c0_i32 : i32, i32
  }
}

</mosaic_0001>

<bundles_post_ra>
// kernel: rnn_decoder_forward.1
= control target key start
LH: loop header
LB: loop body
LE: loop exit
PB: predicated region body
PF: predicated region fallthrough
CT: control target
= control target key end

     0   :  { %vm90_vm0 = vcmask 261120   ;;  %v1668_v8 = vmov 0.0|0.0   ;;  %vm1669_vm1 = vmmov 0   ;;  %v1670_v38 = vmov 0.0   ;;  %s1673_s28 = smov 32   ;;  %s2035_s3 = inlined_call_operand.vmem [shape: bf16[32,32], index: 3, kind: input, shape index: {}]   ;;  %s2036_s0 = inlined_call_operand.vmem [shape: bf16[64,32], index: 0, kind: input, shape index: {}]   ;;  %s2037_s5 = inlined_call_operand.vmem [shape: bf16[32,128], index: 5, kind: input, shape index: {}]   ;;  %s2038_s4 = inlined_call_operand.vmem [shape: f32[1,32], index: 4, kind: input, shape index: {}]   ;;  %s2039_s6 = inlined_call_operand.vmem [shape: f32[32,128], index: 6, kind: input, shape index: {}]   ;;  %s2040_s8 = inlined_call_operand.vmem [shape: f32[32,128], index: 8, kind: input, shape index: {}]   ;;  %s2041_s1 = inlined_call_operand.vmem [shape: f32[8,32], index: 1, kind: input, shape index: {}]   ;;  %s2042_s7 = inlined_call_operand.vmem [shape: f32[1,128], index: 7, kind: input, shape index: {}]   ;;  %s2043_s2 = inlined_call_operand.vmem [shape: f32[64,1], index: 2, kind: input, shape index: {}]   ;;  %s2044_s9 = inlined_call_operand.vmem [shape: bf16[32,128], index: 9, kind: input, shape index: {}]   ;;  %s2045_s10 = inlined_call_operand.vmem [shape: f32[1,128], index: 10, kind: input, shape index: {}]   ;;  %s2046_s11 = inlined_call_operand.vmem [shape: f32[64,128], index: 11, kind: output, shape index: {}]  }
   0x1   :  { %v1626_v0 = vld [vmem:[%s2035_s3] sm:$0xff]   ;;  %v1627_v1 = vld [vmem:[%s2035_s3 + $0x8] sm:$0xff]   ;;  %v1630_v4 = vld [vmem:[%s2036_s0 + $0x10] sm:$0xff]   ;;  %v359_v57 = vlaneseq }
   0x2   :  { %1424 = vmatprep.subr.bf16.mxu0 %v1626_v0  ;;  %v1628_v2 = vld [vmem:[%s2036_s0] sm:$0xff]   ;;  %v1629_v3 = vld [vmem:[%s2036_s0 + $0x8] sm:$0xff]   ;;  %v1631_v5 = vld [vmem:[%s2036_s0 + $0x18] sm:$0xff]  }
   0x3   :  { %1425 = vmatpush3.bf16.msra.mxu0 %v1626_v0  ;;  %1428 = vmatprep.mubr.msk.bf16.mxu0 %vm90_vm0, %v1628_v2  ;;  %v1632_v6 = vld [vmem:[%s2037_s5] sm:$0xff]   ;;  %v1633_v7 = vld [vmem:[%s2037_s5 + $0x8] sm:$0xff]   ;;  %v283_v30 = vld [vmem:[%s2039_s6 + $0x10] sm:$0xff]  ;;  %v360_v61 = vand.u32 127, %v359_v57 }
   0x4   :  { %1426 = vmatprep.subr.bf16.mxu0 %v1627_v1  ;;  %1613 = vmatprep.subr.bf16.mxu1 %v1632_v6  ;;  %v1328_v9 = vld [vmem:[%s2038_s4] ss:$0 sm:$0xff]  ;;  %v282_v21 = vld [vmem:[%s2039_s6 + $0x8] sm:$0xff]  ;;  %v284_v31 = vld [vmem:[%s2039_s6 + $0x18] sm:$0xff] }
   0x5   :  { %1615 = vmatpush3.bf16.msra.mxu1 %v1632_v6  ;;  %v281_v20 = vld [vmem:[%s2039_s6] sm:$0xff]  ;;  %v1563_v37 = vpack.c.bf16 %v284_v31, %v283_v30  ;;  %v367_v42 = vld [vmem:[%s2040_s8 + $0x8] sm:$0xff]  ;;  %v368_v49 = vld [vmem:[%s2040_s8 + $0x10] sm:$0xff]  ;;  %vm361_vm2 = vcmp.ge.s32.totalorder %v360_v61, 64  ;;  %vm362_vm3 = vcmp.lt.s32.totalorder %v360_v61, 96 }
   0x6   :  { %1614 = vmatprep.subr.bf16.mxu1 %v1633_v7  ;;  %v1560_v27 = vpack.c.bf16 %v282_v21, %v281_v20  ;;  %v366_v41 = vld [vmem:[%s2040_s8] sm:$0xff]  ;;  %v369_v50 = vld [vmem:[%s2040_s8 + $0x18] sm:$0xff]  ;;  %vm363_vm4 = vmand %vm361_vm2, %vm362_vm3 }
   0x7   :  { %1427 = vmatpush3.bf16.msra.mxu0 %v1627_v1  ;;  %v280_v47 = vld [vmem:[%s2041_s1] sm:$0xff]  ;;  %v1794_v48 = vpack.c.bf16 %v367_v42, %v366_v41  ;;  %v1807_v51 = vpack.c.bf16 %v369_v50, %v368_v49 }
   0x8   :  { %1436 = vmatprep.subr.bf16.mxu0 %v1632_v6  ;;  %v1339_v52 = vld [vmem:[%s2042_s7] ss:$0 sm:$0xff]  ;;  %s1672_s7 = smov 64  }
   0x9   :  { %1616 = vmatpush3.bf16.msra.mxu1 %v1633_v7 }
   0xa   :  { %1429 = vmatmul.mubr.msk.bf16.vlgmr.msra.gmra.mrb[0].mxu0 %vm90_vm0, %v1629_v3  ;;  %1565 = vmatprep.subr.bf16.mxu1 %v1668_v8 }
   0xb   :  { %1432 = vmatprep.mubr.msk.bf16.mxu0 %vm90_vm0, %v1630_v4  ;;  %1437 = vmatpush3.bf16.msra.mxu0 %v1632_v6 }
   0xc   :  { %1438 = vmatprep.subr.bf16.mxu0 %v1633_v7 }
   0xf   :  { %1439 = vmatpush3.bf16.msra.mxu0 %v1633_v7 }
  0x10   :  { %1559 = vmatprep.subr.bf16.mxu0 %v1668_v8 }
  0x12   :  { %1433 = vmatmul.mubr.msk.bf16.gmra.mrb[4].mxu0 %vm90_vm0, %v1631_v5 }
  0xdd   :  { %v1430_v10 = vpop.f32.mrb[0].mxu0 }
  0xde   :  { %v146_v11 = vadd.f32 %v1430_v10, %v1328_v9  ;;  %v137_v12 = vpop.f32.mrb[1].mxu0 }
  0xdf   :  { %v138_v13 = vadd.f32 %v1328_v9, %v137_v12  ;;  %v1431_v14 = vpop.f32.mrb[2].mxu0 }
  0xe0   :  { %v149_v15 = vadd.f32 %v1431_v14, %v1328_v9  ;;  %v140_v16 = vpop.f32.mrb[3].mxu0  ;;  %v170_v18 = vmax.f32 %v146_v11, 0.0  ;;  %v1671_v11 = vmov 0.5  }
  0xe1   :  { %v141_v17 = vadd.f32 %v1328_v9, %v140_v16  ;;  %v168_v22 = vmax.f32 %v138_v13, 0.0  ;;  %v1842_v12 = vsel %vm363_vm4, 1.0, %v1671_v11 }
  0xe2   :  { %v171_v19 = vmax.f32 %v149_v15, 0.0 }
  0xe3   :  { %v169_v23 = vmax.f32 %v141_v17, 0.0 }
  0xe4   :  { %v177_v24 = vpack.c.bf16 %v171_v19, %v170_v18  ;;  %v1845_v18 = vsel %vm363_vm4, 0.0, %v1671_v11 }
  0xe5   :  { %v176_v25 = vpack.c.bf16 %v169_v23, %v168_v22  ;;  %v1434_v26 = vpop.f32.mrb[4].mxu0 }
  0xe6   :  { %v162_v28 = vadd.f32 %v1434_v26, %v1328_v9  ;;  %v153_v29 = vpop.f32.mrb[5].mxu0 }
  0xe7   :  { %v154_v32 = vadd.f32 %v1328_v9, %v153_v29  ;;  %v1435_v33 = vpop.f32.mrb[6].mxu0  ;;  %1440 = vmatprep.mubr.msk.bf16.mxu0 %vm90_vm0, %v176_v25 }
  0xe8   :  { %v165_v34 = vadd.f32 %v1435_v33, %v1328_v9  ;;  %v156_v35 = vpop.f32.mrb[7].mxu0  ;;  %1441 = vmatmul.mubr.msk.bf16.vlgmr.msra.gmra.mrb[8].mxu0 %vm90_vm0, %v177_v24  ;;  %v174_v39 = vmax.f32 %v162_v28, 0.0 }
  0xe9   :  { %v157_v36 = vadd.f32 %v1328_v9, %v156_v35  ;;  %1561 = vmatpush3.bf16.msra.mxu0 %v1560_v27  ;;  %1456 = vmatprep.mubr.msk.f32.mxu0 %vm1669_vm1, %v1670_v38  ;;  %v172_v43 = vmax.f32 %v154_v32, 0.0 }
  0xea   :  { %v175_v40 = vmax.f32 %v165_v34, 0.0  ;;  %1562 = vmatprep.subr.bf16.mxu0 %v1668_v8 }
  0xeb   :  { %v173_v44 = vmax.f32 %v157_v36, 0.0 }
  0xec   :  { %v179_v45 = vpack.c.bf16 %v175_v40, %v174_v39 }
  0xed   :  { %1564 = vmatpush3.bf16.msra.mxu0 %v1563_v37  ;;  %v178_v46 = vpack.c.bf16 %v173_v44, %v172_v43 }
  0xee   :  { %1571 = vmatprep.subr.bf16.mxu0 %v1668_v8 }
  0xef   :  { %1444 = vmatprep.mubr.msk.bf16.mxu1 %vm90_vm0, %v178_v46 }
  0xf0   :  { %1445 = vmatmul.mubr.msk.bf16.vlgmr.msra.gmra.mrb[0].mxu1 %vm90_vm0, %v179_v45  ;;  %1457 = vmatmul.mubr.msk.f32.vlgmr.msra.gmra.mrb[12].mxu0 %vm90_vm0, %v280_v47 }
  0xf1   :  { %1567 = vmatpush3.bf16.msra.mxu1 %v1794_v48  ;;  %1467 = vmatprep.mubr.msk.f32.mxu1 %vm1669_vm1, %v1670_v38 }
  0xf2   :  { %1568 = vmatprep.subr.bf16.mxu1 %v1668_v8  ;;  %1573 = vmatpush3.bf16.msra.mxu0 %v1794_v48 }
  0xf3   :  { %1574 = vmatprep.subr.bf16.mxu0 %v1668_v8  ;;  %1478 = vmatprep.mubr.msk.f32.mxu0 %vm1669_vm1, %v1670_v38 }
  0xf5   :  { %1570 = vmatpush3.bf16.msra.mxu1 %v1807_v51 }
  0xf6   :  { %1576 = vmatpush3.bf16.msra.mxu0 %v1807_v51  ;;  %1577 = vmatprep.subr.bf16.mxu1 %v1668_v8 }
  0xf7   :  { %1583 = vmatprep.subr.bf16.mxu0 %v1668_v8 }
  0xf8   :  { %1468 = vmatmul.mubr.f32.vlgmr.msra.gmra.mrb[4].mxu1 %v1670_v38 }
  0xf9   :  { %1579 = vmatpush3.bf16.msra.mxu1 %v1794_v48  ;;  %1489 = vmatprep.mubr.msk.f32.mxu1 %vm1669_vm1, %v1670_v38 }
  0xfa   :  { %1580 = vmatprep.subr.bf16.mxu1 %v1668_v8 }
  0xfd   :  { %1582 = vmatpush3.bf16.msra.mxu1 %v1807_v51 }
  0xfe   :  { %1589 = vmatprep.subr.bf16.mxu1 %v1668_v8 }
 0x1bb   :  { %v1442_v53 = vpop.f32.mrb[8].mxu0 }
 0x1bc   :  { %v1830_v54 = vadd.f32 %v1442_v53, %v1339_v52  ;;  %v249_v55 = vpop.f32.mrb[9].mxu0 }
 0x1bd   :  { %v1443_v56 = vpop.f32.mrb[10].mxu0  ;;  %v250_v62 = vadd.f32 %v1339_v52, %v249_v55 }
 0x1be   :  { %v1832_v58 = vadd.f32 %v1443_v56, %v1339_v52  ;;  %v252_v59 = vpop.f32.mrb[11].mxu0 }
 0x1bf   :  { %v253_v60 = vadd.f32 %v1339_v52, %v252_v59 }
 0x1c3   :  { %v1446_v63 = vpop.f32.mrb[0].mxu1  ;;  %v354_v0 = vpop.f32.mrb[12].mxu0 }
 0x1c4   :  { %v1834_v1 = vadd.f32 %v1446_v63, %v1339_v52  ;;  %v358_v2 = vadd.f32 %v354_v0, %v250_v62  ;;  %v265_v3 = vpop.f32.mrb[1].mxu1  ;;  %v1458_v4 = vpop.f32.mrb[13].mxu0 }
 0x1c5   :  { %v1836_v5 = vadd.f32 %v1339_v52, %v265_v3  ;;  %v1447_v6 = vpop.f32.mrb[2].mxu1 }
 0x1c6   :  { %v1838_v7 = vadd.f32 %v1447_v6, %v1339_v52  ;;  %v268_v9 = vpop.f32.mrb[3].mxu1 }
 0x1c7   :  { %v1840_v10 = vadd.f32 %v1339_v52, %v268_v9 }
 0x1cb   :  { %v439_v13 = vpop.f32.mrb[4].mxu1 }
 0x1cc   :  { %v443_v14 = vadd.f32 %v439_v13, %v358_v2  ;;  %v1469_v15 = vpop.f32.mrb[5].mxu1 }
 0x1ce   :  { %v444_v16 = vmul.f32 %v443_v14, %v1842_v12 }
 0x1d0   :  { %1636 = vtanh.f32 %v444_v16 }
 0x1da   :  { %v1637_v17 = vpop.eup %1636 }
 0x1db   :  { %v446_v19 = vmul.f32 %v1637_v17, %v1842_v12 }
 0x1dd   :  { %v447_v20 = vadd.f32 %v446_v19, %v1845_v18 }
 0x1df   :  { %450 = vrot.lane.b32.xlu0 %v447_v20, %s1672_s7  ;;  %v448_v23 = vmul.f32 0.0, %v447_v20 }
 0x251   :  { %v451_v21 = vpop.permute.xlu0 %450 }
 0x252   :  { %v453_v22 = vmul.f32 %v451_v21, %v447_v20 }
 0x254   :  { %455 = vrot.lane.b32.xlu0 %v453_v22, %s1673_s28 }
 0x2c6   :  { %v456_v24 = vpop.permute.xlu0 %455 }
 0x2c7   :  { %v458_v25 = vadd.f32 %v456_v24, %v448_v23 }
 0x2c9   :  { %1638 = vtanh.f32 %v458_v25 }
 0x2d3   :  { %v1639_v26 = vpop.eup %1638 }
 0x2d4   :  { %461 = vrot.lane.b32.xlu1 %v1639_v26, %s1672_s7 }
 0x346   :  { %v462_v27 = vpop.permute.xlu1 %461 }
 0x347   :  { %v1852_v28 = vmul.f32 %v462_v27, %v447_v20 }
 0x349   :  { %466 = vrot.lane.b32.xlu1 %v1852_v28, %s1673_s28 }
 0x3bb   :  { %v467_v29 = vpop.permute.xlu1 %466 }
 0x3bc   :  { %1479 = vmatmul.mubr.msk.f32.vlgmr.msra.gmra.mrb[14].mxu0 %vm90_vm0, %v467_v29 }
 0x3bd   :  { %1585 = vmatpush3.bf16.msra.mxu0 %v1794_v48  ;;  %1500 = vmatprep.mubr.msk.f32.mxu0 %vm1669_vm1, %v1670_v38 }
 0x3be   :  { %1586 = vmatprep.subr.bf16.mxu0 %v1668_v8 }
 0x3c1   :  { %1588 = vmatpush3.bf16.msra.mxu0 %v1807_v51 }
 0x3c2   :  { %1595 = vmatprep.subr.bf16.mxu0 %v1668_v8 }
 0x48f   :  { %v536_v30 = vpop.f32.mrb[14].mxu0 }
 0x490   :  { %v540_v31 = vadd.f32 %v536_v30, %v253_v60  ;;  %v1480_v32 = vpop.f32.mrb[15].mxu0 }
 0x492   :  { %v541_v33 = vmul.f32 %v540_v31, %v1842_v12 }
 0x494   :  { %1640 = vtanh.f32 %v541_v33 }
 0x49e   :  { %v1641_v34 = vpop.eup %1640 }
 0x49f   :  { %v543_v35 = vmul.f32 %v1641_v34, %v1842_v12 }
 0x4a1   :  { %v544_v36 = vadd.f32 %v543_v35, %v1845_v18 }
 0x4a3   :  { %547 = vrot.lane.b32.xlu0 %v544_v36, %s1672_s7  ;;  %v545_v40 = vmul.f32 %v544_v36, %v458_v25 }
 0x515   :  { %v548_v37 = vpop.permute.xlu0 %547 }
 0x516   :  { %v550_v39 = vmul.f32 %v548_v37, %v544_v36 }
 0x518   :  { %552 = vrot.lane.b32.xlu1 %v550_v39, %s1673_s28 }
 0x58a   :  { %v553_v41 = vpop.permute.xlu1 %552 }
 0x58b   :  { %v555_v42 = vadd.f32 %v553_v41, %v545_v40 }
 0x58d   :  { %1642 = vtanh.f32 %v555_v42 }
 0x597   :  { %v1643_v43 = vpop.eup %1642 }
 0x598   :  { %558 = vrot.lane.b32.xlu0 %v1643_v43, %s1672_s7 }
 0x60a   :  { %v559_v44 = vpop.permute.xlu0 %558 }
 0x60b   :  { %v1869_v45 = vmul.f32 %v559_v44, %v544_v36 }
 0x60d   :  { %563 = vrot.lane.b32.xlu1 %v1869_v45, %s1673_s28 }
 0x67f   :  { %v564_v46 = vpop.permute.xlu1 %563 }
 0x680   :  { %1490 = vmatmul.mubr.msk.f32.vlgmr.msra.gmra.mrb[6].mxu1 %vm90_vm0, %v564_v46 }
 0x681   :  { %1591 = vmatpush3.bf16.msra.mxu1 %v1794_v48  ;;  %1511 = vmatprep.mubr.msk.f32.mxu1 %vm1669_vm1, %v1670_v38 }
 0x682   :  { %1592 = vmatprep.subr.bf16.mxu1 %v1668_v8 }
 0x685   :  { %1594 = vmatpush3.bf16.msra.mxu1 %v1807_v51 }
 0x686   :  { %1601 = vmatprep.subr.bf16.mxu1 %v1668_v8 }
 0x753   :  { %v633_v47 = vpop.f32.mrb[6].mxu1 }
 0x754   :  { %v637_v49 = vadd.f32 %v633_v47, %v1830_v54  ;;  %v1491_v50 = vpop.f32.mrb[7].mxu1 }
 0x756   :  { %v638_v52 = vmul.f32 %v637_v49, %v1842_v12 }
 0x758   :  { %1644 = vtanh.f32 %v638_v52 }
 0x762   :  { %v1645_v53 = vpop.eup %1644 }
 0x763   :  { %v640_v55 = vmul.f32 %v1645_v53, %v1842_v12 }
 0x765   :  { %v641_v56 = vadd.f32 %v640_v55, %v1845_v18 }
 0x767   :  { %644 = vrot.lane.b32.xlu0 %v641_v56, %s1672_s7  ;;  %v642_v60 = vmul.f32 %v641_v56, %v555_v42 }
 0x7d9   :  { %v645_v57 = vpop.permute.xlu0 %644 }
 0x7da   :  { %v647_v59 = vmul.f32 %v645_v57, %v641_v56 }
 0x7dc   :  { %649 = vrot.lane.b32.xlu1 %v647_v59, %s1673_s28 }
 0x84e   :  { %v650_v61 = vpop.permute.xlu1 %649 }
 0x84f   :  { %v652_v62 = vadd.f32 %v650_v61, %v642_v60 }
 0x851   :  { %1646 = vtanh.f32 %v652_v62 }
 0x85b   :  { %v1647_v54 = vpop.eup %1646 }
 0x85c   :  { %655 = vrot.lane.b32.xlu0 %v1647_v54, %s1672_s7 }
 0x8ce   :  { %v656_v63 = vpop.permute.xlu0 %655 }
 0x8cf   :  { %v1887_v0 = vmul.f32 %v656_v63, %v641_v56 }
 0x8d1   :  { %660 = vrot.lane.b32.xlu1 %v1887_v0, %s1673_s28 }
 0x943   :  { %v661_v2 = vpop.permute.xlu1 %660 }
 0x944   :  { %1501 = vmatmul.mubr.msk.f32.vlgmr.msra.gmra.mrb[16].mxu0 %vm90_vm0, %v661_v2 }
 0x945   :  { %1597 = vmatpush3.bf16.msra.mxu0 %v1794_v48  ;;  %1522 = vmatprep.mubr.msk.f32.mxu0 %vm1669_vm1, %v1670_v38 }
 0x946   :  { %1598 = vmatprep.subr.bf16.mxu0 %v1668_v8 }
 0x949   :  { %1600 = vmatpush3.bf16.msra.mxu0 %v1807_v51 }
 0x94a   :  { %1607 = vmatprep.subr.bf16.mxu0 %v1668_v8 }
 0xa17   :  { %v730_v3 = vpop.f32.mrb[16].mxu0 }
 0xa18   :  { %v734_v4 = vadd.f32 %v730_v3, %v1832_v58  ;;  %v1502_v6 = vpop.f32.mrb[17].mxu0 }
 0xa1a   :  { %v735_v9 = vmul.f32 %v734_v4, %v1842_v12 }
 0xa1c   :  { %1648 = vtanh.f32 %v735_v9 }
 0xa26   :  { %v1649_v11 = vpop.eup %1648 }
 0xa27   :  { %v737_v13 = vmul.f32 %v1649_v11, %v1842_v12 }
 0xa29   :  { %v738_v14 = vadd.f32 %v737_v13, %v1845_v18 }
 0xa2b   :  { %741 = vrot.lane.b32.xlu0 %v738_v14, %s1672_s7  ;;  %v739_v17 = vmul.f32 %v738_v14, %v652_v62 }
 0xa9d   :  { %v742_v15 = vpop.permute.xlu0 %741 }
 0xa9e   :  { %v744_v16 = vmul.f32 %v742_v15, %v738_v14 }
 0xaa0   :  { %746 = vrot.lane.b32.xlu1 %v744_v16, %s1673_s28 }
 0xb12   :  { %v747_v19 = vpop.permute.xlu1 %746 }
 0xb13   :  { %v749_v20 = vadd.f32 %v747_v19, %v739_v17 }
 0xb15   :  { %1650 = vtanh.f32 %v749_v20 }
 0xb1f   :  { %v1651_v58 = vpop.eup %1650 }
 0xb20   :  { %752 = vrot.lane.b32.xlu0 %v1651_v58, %s1672_s7 }
 0xb92   :  { %v753_v21 = vpop.permute.xlu0 %752 }
 0xb93   :  { %v1905_v22 = vmul.f32 %v753_v21, %v738_v14  ;;  %v1674_v14 = vmov 0  }
 0xb94   :  { %1624 = vset.pattern.permute.xlu0 %v1674_v14  ;;  %1625 = vset.pattern.permute.xlu1 %v1674_v14 }
 0xb95   :  { %757 = vrot.lane.b32.xlu1 %v1905_v22, %s1673_s28 }
 0xc07   :  { %v758_v23 = vpop.permute.xlu1 %757 }
 0xc08   :  { %1512 = vmatmul.mubr.msk.f32.vlgmr.msra.gmra.mrb[8].mxu1 %vm90_vm0, %v758_v23  ;;  %v1144_v23 = vld [vmem:[%s2043_s2] sm:$0xff] }
 0xc09   :  { %1603 = vmatpush3.bf16.msra.mxu1 %v1794_v48  ;;  %1533 = vmatprep.mubr.msk.f32.mxu1 %vm1669_vm1, %v1670_v38 }
 0xc0a   :  { %1604 = vmatprep.subr.bf16.mxu1 %v1668_v8 }
 0xc0d   :  { %1606 = vmatpush3.bf16.msra.mxu1 %v1807_v51 }
 0xcdb   :  { %v827_v24 = vpop.f32.mrb[8].mxu1 }
 0xcdc   :  { %v831_v25 = vadd.f32 %v827_v24, %v1836_v5  ;;  %v1513_v26 = vpop.f32.mrb[9].mxu1  ;;  %v1149_v24 = vld [vmem:[%s2043_s2 + $0x28] sm:$0xff] }
 0xcdd   :  { %v1145_v26 = vld [vmem:[%s2043_s2 + $0x8] sm:$0xff] }
 0xcde   :  { %v832_v27 = vmul.f32 %v831_v25, %v1842_v12 }
 0xce0   :  { %1652 = vtanh.f32 %v832_v27  ;;  %v1146_v27 = vld [vmem:[%s2043_s2 + $0x10] sm:$0xff] }
 0xcea   :  { %v1653_v29 = vpop.eup %1652 }
 0xceb   :  { %v834_v30 = vmul.f32 %v1653_v29, %v1842_v12  ;;  %v1148_v29 = vld [vmem:[%s2043_s2 + $0x20] sm:$0xff] }
 0xced   :  { %v835_v31 = vadd.f32 %v834_v30, %v1845_v18  ;;  %v1150_v30 = vld [vmem:[%s2043_s2 + $0x30] sm:$0xff] }
 0xcef   :  { %838 = vrot.lane.b32.xlu0 %v835_v31, %s1672_s7  ;;  %v836_v34 = vmul.f32 %v835_v31, %v749_v20 }
 0xd61   :  { %v839_v32 = vpop.permute.xlu0 %838 }
 0xd62   :  { %v841_v33 = vmul.f32 %v839_v32, %v835_v31 }
 0xd64   :  { %843 = vrot.lane.b32.xlu1 %v841_v33, %s1673_s28 }
 0xdd6   :  { %v844_v35 = vpop.permute.xlu1 %843 }
 0xdd7   :  { %v846_v36 = vadd.f32 %v844_v35, %v836_v34  ;;  %v1634_v34 = vld [vmem:[%s2044_s9] sm:$0xff]   ;;  %v1635_v35 = vld [vmem:[%s2044_s9 + $0x8] sm:$0xff]  }
 0xdd8   :  { %1547 = vmatprep.subr.bf16.mxu1 %v1634_v34 }
 0xdd9   :  { %1654 = vtanh.f32 %v846_v36 }
 0xde3   :  { %v1655_v5 = vpop.eup %1654 }
 0xde4   :  { %849 = vrot.lane.b32.xlu0 %v1655_v5, %s1672_s7 }
 0xe56   :  { %v850_v37 = vpop.permute.xlu0 %849 }
 0xe57   :  { %v1922_v39 = vmul.f32 %v850_v37, %v835_v31 }
 0xe59   :  { %854 = vrot.lane.b32.xlu1 %v1922_v39, %s1673_s28 }
 0xecb   :  { %v855_v40 = vpop.permute.xlu1 %854 }
 0xecc   :  { %1523 = vmatmul.mubr.msk.f32.vlgmr.msra.gmra.mrb[18].mxu0 %vm90_vm0, %v855_v40 }
 0xecd   :  { %1609 = vmatpush3.bf16.msra.mxu0 %v1794_v48  ;;  %1544 = vmatprep.mubr.msk.f32.mxu0 %vm1669_vm1, %v1670_v38 }
 0xece   :  { %1610 = vmatprep.subr.bf16.mxu0 %v1668_v8 }
 0xed1   :  { %1612 = vmatpush3.bf16.msra.mxu0 %v1807_v51 }
 0xf9f   :  { %v924_v41 = vpop.f32.mrb[18].mxu0 }
 0xfa0   :  { %v928_v42 = vadd.f32 %v924_v41, %v1840_v10  ;;  %v1524_v43 = vpop.f32.mrb[19].mxu0 }
 0xfa2   :  { %v929_v44 = vmul.f32 %v928_v42, %v1842_v12 }
 0xfa4   :  { %1656 = vtanh.f32 %v929_v44 }
 0xfae   :  { %v1657_v46 = vpop.eup %1656 }
 0xfaf   :  { %v931_v47 = vmul.f32 %v1657_v46, %v1842_v12 }
 0xfb1   :  { %v932_v49 = vadd.f32 %v931_v47, %v1845_v18 }
 0xfb3   :  { %935 = vrot.lane.b32.xlu0 %v932_v49, %s1672_s7  ;;  %v933_v8 = vmul.f32 %v932_v49, %v846_v36 }
0x1025   :  { %v936_v48 = vpop.permute.xlu0 %935 }
0x1026   :  { %v938_v38 = vmul.f32 %v936_v48, %v932_v49 }
0x1028   :  { %940 = vrot.lane.b32.xlu1 %v938_v38, %s1673_s28 }
0x109a   :  { %v941_v51 = vpop.permute.xlu1 %940 }
0x109b   :  { %v943_v50 = vadd.f32 %v941_v51, %v933_v8 }
0x109d   :  { %1658 = vtanh.f32 %v943_v50 }
0x10a7   :  { %v1659_v10 = vpop.eup %1658 }
0x10a8   :  { %946 = vrot.lane.b32.xlu0 %v1659_v10, %s1672_s7 }
0x111a   :  { %v947_v52 = vpop.permute.xlu0 %946 }
0x111b   :  { %v1939_v53 = vmul.f32 %v947_v52, %v932_v49 }
0x111d   :  { %951 = vrot.lane.b32.xlu1 %v1939_v53, %s1673_s28 }
0x118f   :  { %v952_v55 = vpop.permute.xlu1 %951 }
0x1190   :  { %1534 = vmatmul.mubr.msk.f32.vlgmr.msra.gmra.mrb[10].mxu1 %vm90_vm0, %v952_v55 }
0x1191   :  { %1548 = vmatpush3.bf16.msra.mxu1 %v1634_v34 }
0x1192   :  { %1549 = vmatprep.subr.bf16.mxu1 %v1635_v35 }
0x1195   :  { %1550 = vmatpush3.bf16.msra.mxu1 %v1635_v35 }
0x1263   :  { %v1021_v56 = vpop.f32.mrb[10].mxu1 }
0x1264   :  { %v1025_v57 = vadd.f32 %v1021_v56, %v1834_v1  ;;  %v1535_v59 = vpop.f32.mrb[11].mxu1 }
0x1265   :  { %v1354_v59 = vld [vmem:[%s2045_s10] ss:$0 sm:$0xff] }
0x1266   :  { %v1026_v60 = vmul.f32 %v1025_v57, %v1842_v12 }
0x1268   :  { %1660 = vtanh.f32 %v1026_v60 }
0x1272   :  { %v1661_v61 = vpop.eup %1660 }
0x1273   :  { %v1028_v62 = vmul.f32 %v1661_v61, %v1842_v12 }
0x1275   :  { %v1029_v54 = vadd.f32 %v1028_v62, %v1845_v18 }
0x1277   :  { %1032 = vrot.lane.b32.xlu0 %v1029_v54, %s1672_s7  ;;  %v1030_v3 = vmul.f32 %v1029_v54, %v943_v50 }
0x12e9   :  { %v1033_v63 = vpop.permute.xlu0 %1032 }
0x12ea   :  { %v1035_v2 = vmul.f32 %v1033_v63, %v1029_v54 }
0x12ec   :  { %1037 = vrot.lane.b32.xlu1 %v1035_v2, %s1673_s28 }
0x135e   :  { %v1038_v4 = vpop.permute.xlu1 %1037 }
0x135f   :  { %v1040_v6 = vadd.f32 %v1038_v4, %v1030_v3 }
0x1361   :  { %1662 = vtanh.f32 %v1040_v6 }
0x136b   :  { %v1663_v1 = vpop.eup %1662 }
0x136c   :  { %1043 = vrot.lane.b32.xlu0 %v1663_v1, %s1672_s7 }
0x13de   :  { %v1044_v9 = vpop.permute.xlu0 %1043 }
0x13df   :  { %v1951_v11 = vmul.f32 %v1044_v9, %v1029_v54 }
0x13e1   :  { %1048 = vrot.lane.b32.xlu1 %v1951_v11, %s1673_s28 }
0x1453   :  { %v1049_v13 = vpop.permute.xlu1 %1048 }
0x1454   :  { %1545 = vmatmul.mubr.msk.f32.vlgmr.msra.gmra.mrb[20].mxu0 %vm90_vm0, %v1049_v13 }
0x1527   :  { %v1118_v15 = vpop.f32.mrb[20].mxu0 }
0x1528   :  { %v1122_v16 = vadd.f32 %v1118_v15, %v1838_v7  ;;  %v1546_v17 = vpop.f32.mrb[21].mxu0  ;;  %v1147_v7 = vld [vmem:[%s2043_s2 + $0x18] sm:$0xff] }
0x152a   :  { %v1123_v19 = vmul.f32 %v1122_v16, %v1842_v12 }
0x152c   :  { %1664 = vtanh.f32 %v1123_v19 }
0x1536   :  { %v1665_v20 = vpop.eup %1664 }
0x1537   :  { %v1125_v58 = vmul.f32 %v1665_v20, %v1842_v12  ;;  %v1151_v12 = vld [vmem:[%s2043_s2 + $0x38] sm:$0xff] }
0x1539   :  { %v1126_v21 = vadd.f32 %v1125_v58, %v1845_v18 }
0x153b   :  { %1129 = vrot.lane.b32.xlu0 %v1126_v21, %s1672_s7  ;;  %v1127_v31 = vmul.f32 %v1126_v21, %v1040_v6 }
0x153f   :  { %1154 = vperm.xlu0 %1624, %v1144_v23  }
0x1543   :  { %1169 = vperm.xlu0 %1624, %v1147_v7  }
0x1547   :  { %1179 = vperm.xlu0 %1624, %v1149_v24  }
0x154b   :  { %1189 = vperm.xlu0 %1624, %v1151_v12  }
0x15ad   :  { %v1130_v18 = vpop.permute.xlu0 %1129 }
0x15ae   :  { %v1132_v25 = vmul.f32 %v1130_v18, %v1126_v21 }
0x15b0   :  { %1134 = vrot.lane.b32.xlu1 %v1132_v25, %s1673_s28 }
0x15b4   :  { %1159 = vperm.xlu1 %1625, %v1145_v26  }
0x15b8   :  { %1164 = vperm.xlu1 %1625, %v1146_v27  }
0x15bc   :  { %1174 = vperm.xlu1 %1625, %v1148_v29  }
0x15be   :  { %v1155_v36 = vpop.permute.xlu0 %1154 }
0x15bf   :  { %v1192_v41 = vmul.f32 %v1155_v36, %v1852_v28 }
0x15c0   :  { %1184 = vperm.xlu1 %1625, %v1150_v30  }
0x15c2   :  { %v1170_v37 = vpop.permute.xlu0 %1169 }
0x15c3   :  { %v1195_v46 = vmul.f32 %v1170_v37, %v1905_v22 }
0x15c6   :  { %v1180_v49 = vpop.permute.xlu0 %1179 }
0x15c7   :  { %v1197_v8 = vmul.f32 %v1180_v49, %v1939_v53 }
0x15ca   :  { %v1190_v22 = vpop.permute.xlu0 %1189 }
0x1622   :  { %v1135_v32 = vpop.permute.xlu1 %1134 }
0x1623   :  { %v1137_v33 = vadd.f32 %v1135_v32, %v1127_v31 }
0x1625   :  { %1666 = vtanh.f32 %v1137_v33 }
0x162f   :  { %v1667_v5 = vpop.eup %1666 }
0x1630   :  { %1140 = vrot.lane.b32.xlu1 %v1667_v5, %s1672_s7 }
0x1633   :  { %v1160_v40 = vpop.permute.xlu1 %1159 }
0x1634   :  { %v1193_v42 = vmul.f32 %v1160_v40, %v1869_v45 }
0x1636   :  { %v1200_v43 = vpack.c.bf16 %v1193_v42, %v1192_v41 }
0x1637   :  { %v1165_v44 = vpop.permute.xlu1 %1164 }
0x1638   :  { %v1194_v47 = vmul.f32 %v1165_v44, %v1887_v0  ;;  %1219 = vrot.lane.b32.xlu0 %v1200_v43, %s1673_s28 }
0x163a   :  { %v1201_v48 = vpack.c.bf16 %v1195_v46, %v1194_v47 }
0x163b   :  { %v1175_v38 = vpop.permute.xlu1 %1174 }
0x163c   :  { %v1196_v51 = vmul.f32 %v1175_v38, %v1922_v39  ;;  %1221 = vrot.lane.b32.xlu1 %v1201_v48, %s1673_s28 }
0x163e   :  { %v1202_v28 = vpack.c.bf16 %v1197_v8, %v1196_v51 }
0x163f   :  { %v1185_v45 = vpop.permute.xlu1 %1184 }
0x1640   :  { %1223 = vrot.lane.b32.xlu0 %v1202_v28, %s1673_s28  ;;  %v1198_v0 = vmul.f32 %v1185_v45, %v1951_v11 }
0x16a2   :  { %v1141_v50 = vpop.permute.xlu1 %1140 }
0x16a3   :  { %v1143_v10 = vmul.f32 %v1141_v50, %v1126_v21 }
0x16a5   :  { %v1199_v52 = vmul.f32 %v1190_v22, %v1143_v10 }
0x16a7   :  { %v1203_v55 = vpack.c.bf16 %v1199_v52, %v1198_v0 }
0x16a9   :  { %1225 = vrot.lane.b32.xlu1 %v1203_v55, %s1673_s28 }
0x16aa   :  { %v1220_v56 = vpop.permute.xlu0 %1219 }
0x16ab   :  { %1551 = vmatprep.mubr.msk.bf16.mxu1 %vm90_vm0, %v1220_v56 }
0x16ae   :  { %v1222_v53 = vpop.permute.xlu1 %1221 }
0x16af   :  { %1552 = vmatmul.mubr.msk.bf16.vlgmr.msra.gmra.mrb[12].mxu1 %vm90_vm0, %v1222_v53 }
0x16b2   :  { %v1224_v39 = vpop.permute.xlu0 %1223 }
0x16b3   :  { %1555 = vmatprep.mubr.msk.bf16.mxu1 %vm90_vm0, %v1224_v39 }
0x171b   :  { %v1226_v57 = vpop.permute.xlu1 %1225 }
0x171c   :  { %1556 = vmatmul.mubr.msk.bf16.gmra.mrb[16].mxu1 %vm90_vm0, %v1226_v57 }
0x1782   :  { %v1553_v60 = vpop.f32.mrb[12].mxu1 }
0x1783   :  { %v1294_v61 = vadd.f32 %v1553_v60, %v1354_v59  ;;  %v1285_v62 = vpop.f32.mrb[13].mxu1 }
0x1784   :  { %v1286_v54 = vadd.f32 %v1354_v59, %v1285_v62  ;;  %v1554_v63 = vpop.f32.mrb[14].mxu1 }
0x1785   :  { %1318 = vst [vmem:[%s2046_s11 + $0x10] sm:$0xff] %v1294_v61  ;;  %v1297_v2 = vadd.f32 %v1554_v63, %v1354_v59  ;;  %v1288_v3 = vpop.f32.mrb[15].mxu1 }
0x1786   :  { %1316 = vst [vmem:[%s2046_s11] sm:$0xff] %v1286_v54  ;;  %v1289_v4 = vadd.f32 %v1354_v59, %v1288_v3 }
0x1787   :  { %1319 = vst [vmem:[%s2046_s11 + $0x18] sm:$0xff] %v1297_v2 }
0x1788   :  { %1317 = vst [vmem:[%s2046_s11 + $0x8] sm:$0xff] %v1289_v4 }
0x17ef   :  { %v1557_v6 = vpop.f32.mrb[16].mxu1 }
0x17f0   :  { %v1310_v1 = vadd.f32 %v1557_v6, %v1354_v59  ;;  %v1301_v9 = vpop.f32.mrb[17].mxu1 }
0x17f1   :  { %v1302_v11 = vadd.f32 %v1354_v59, %v1301_v9  ;;  %v1558_v13 = vpop.f32.mrb[18].mxu1 }
0x17f2   :  { %1322 = vst [vmem:[%s2046_s11 + $0x30] sm:$0xff] %v1310_v1  ;;  %v1313_v14 = vadd.f32 %v1558_v13, %v1354_v59  ;;  %v1304_v15 = vpop.f32.mrb[19].mxu1 }
0x17f3   :  { %1320 = vst [vmem:[%s2046_s11 + $0x20] sm:$0xff] %v1302_v11  ;;  %v1305_v16 = vadd.f32 %v1354_v59, %v1304_v15 }
0x17f4   :  { %1323 = vst [vmem:[%s2046_s11 + $0x38] sm:$0xff] %v1313_v14 }
0x17f5   :  { %1321 = vst [vmem:[%s2046_s11 + $0x28] sm:$0xff] %v1305_v16 }

</bundles_post_ra>
